<compile_context>
chip_gen: v7x
topology: tpu7x:2x2x1
jax: 0.10.0
libtpu: 0.0.40
codegen_flags: <defaults>
</compile_context>

<pallas_src>
import math
import functools

import jax
import jax.numpy as jnp
import numpy as np
from jax import lax
from jax.experimental import pallas as pl
from jax.experimental.pallas import tpu as pltpu


# ---------------------------- config (small, synthetic) ----------------------------
HIDDEN_SIZE = 32          # config.hidden_size  (gating_dim)
N_EXPERTS   = 8           # config.moe_config.n_routed_experts
TOP_K       = 2           # config.moe_config.num_experts_per_tok
NORM_TOPK   = True        # config.moe_config.norm_topk_prob
BSZ, SEQ    = 2, 8        # example input sizes

LANE = 128


def _round_up(a, b):
    return (a + b - 1) // b * b


# ---------------------------------- kernel ----------------------------------
def moe_gate_kernel(x_ref, w_ref, idx_ref, wgt_ref, *,
                    top_k, norm_topk_prob, n_valid_experts):
    # x_ref:   (tile, H)    tile of tokens
    # w_ref:   (E_pad, H)   full (padded) gating weight, resident in VMEM
    # idx_ref: (K, tile)    int32 expert indices   (tokens on the lane axis)
    # wgt_ref: (K, tile)    float32 routing weights
    #
    # logits_T = W @ X^T  -> (E_pad, tile).  dot_general contracts the last
    # (hidden) dim of BOTH operands: no w.T / x.T materialized, operands go to
    # the MXU in their native dtype with f32 accumulation.
    logits = lax.dot_general(
        w_ref[...], x_ref[...],
        dimension_numbers=(((1,), (1,)), ((), ())),
        preferred_element_type=jnp.float32)                     # (E_pad, tile)

    e_pad = logits.shape[0]
    sub_iota = lax.broadcasted_iota(jnp.int32, logits.shape, 0)  # expert ids

    # mask padded expert rows (only present if n_routed_experts % 8 != 0)
    if n_valid_experts < e_pad:
        logits = jnp.where(sub_iota < n_valid_experts, logits, -jnp.inf)

    # per-token max over experts (sublane-axis reduce), for a stable exp()
    m = jnp.max(logits, axis=0, keepdims=True)                   # (1, tile)

    # iterative top-k on the LOGITS (softmax is monotone -> same selection),
    # first-occurrence tie-break to match torch.topk / lax.top_k.
    work = logits
    val_rows, idx_rows = [], []
    for _ in range(top_k):
        vmax = jnp.max(work, axis=0, keepdims=True)              # (1, tile)
        hit = work == vmax
        imax = jnp.min(jnp.where(hit, sub_iota, e_pad),
                       axis=0, keepdims=True)                    # (1, tile)
        val_rows.append(vmax)
        idx_rows.append(imax)
        work = jnp.where(sub_iota == imax, -jnp.inf, work)

    topk_logit = jnp.concatenate(val_rows, axis=0)               # (K, tile)
    topk_idx = jnp.concatenate(idx_rows, axis=0)                 # (K, tile)

    # exp only on the K selected rows
    e_sel = jnp.exp(topk_logit - m)                              # (K, tile)

    if top_k > 1 and norm_topk_prob:
        # softmax denominator cancels under top-k renormalization
        denom = jnp.sum(e_sel, axis=0, keepdims=True) + 1e-20
        topk_w = e_sel / denom
    else:
        # full softmax weights (norm_topk_prob=False path)
        z = jnp.sum(jnp.exp(logits - m), axis=0, keepdims=True)
        topk_w = e_sel * pl.reciprocal(z, approx=True)

    idx_ref[...] = topk_idx.astype(jnp.int32)
    wgt_ref[...] = topk_w.astype(wgt_ref.dtype)


# --------------------------------- wrapper ----------------------------------
def moe_gate(hidden_states, weight, *, top_k=TOP_K, norm_topk_prob=NORM_TOPK,
             token_tile=512):
    """Forward of MoEGate (inference). Returns (topk_idx, topk_weight, aux_loss).

    token_tile: tokens per grid step (rounded to a multiple of 128). Size it
    per generation so 2x double-buffered x tiles + the resident weight fit the
    scoped VMEM limit (v7x has half the VMEM of v6e/v5e -> use a smaller tile
    or raise vmem_limit_bytes).
    """
    bsz, seq_len, h = hidden_states.shape
    n_experts, gating_dim = weight.shape
    assert gating_dim == h

    x = hidden_states.reshape(-1, h)                      # (N, H)
    n_tokens = x.shape[0]

    # lane-dense token tile; pad token count to a multiple of the tile
    tile = _round_up(min(token_tile, max(n_tokens, 1)), LANE)
    n_pad = _round_up(n_tokens, tile)
    # keep >= 2 grid steps when there is enough work (v7x: 2 TensorCores)
    if n_pad // tile == 1 and n_pad >= 2 * LANE:
        tile = _round_up(n_pad // 2, LANE)
        n_pad = _round_up(n_tokens, tile)
    if n_pad != n_tokens:
        x = jnp.pad(x, ((0, n_pad - n_tokens), (0, 0)))

    # pad expert dim to a sublane multiple; padded rows are masked in-kernel
    e_pad = _round_up(n_experts, 8)
    if e_pad != n_experts:
        weight = jnp.pad(weight, ((0, e_pad - n_experts), (0, 0)))

    kernel = functools.partial(moe_gate_kernel, top_k=top_k,
                               norm_topk_prob=norm_topk_prob,
                               n_valid_experts=n_experts)

    grid = (n_pad // tile,)
    idx_t, wgt_t = pl.pallas_call(
        kernel,
        out_shape=(
            jax.ShapeDtypeStruct((top_k, n_pad), jnp.int32),
            jax.ShapeDtypeStruct((top_k, n_pad), jnp.float32),
        ),
        grid_spec=pltpu.PrefetchScalarGridSpec(
            num_scalar_prefetch=0,
            grid=grid,
            in_specs=[
                pl.BlockSpec((tile, h), lambda i: (i, 0)),      # x tile (streamed)
                pl.BlockSpec((e_pad, h), lambda i: (0, 0)),     # weight (resident)
            ],
            out_specs=[
                pl.BlockSpec((top_k, tile), lambda i: (0, i)),  # lane-dense outputs
                pl.BlockSpec((top_k, tile), lambda i: (0, i)),
            ],
        ),
        compiler_params=pltpu.CompilerParams(
            dimension_semantics=("parallel",)),
    )(x, weight)

    # back to the PyTorch layout (N, K); drop token padding
    topk_idx = idx_t.T[:n_tokens]
    topk_weight = wgt_t.T[:n_tokens]

    aux_loss = None  # inference path (self.training is False)
    return topk_idx, topk_weight, aux_loss


# ------------------------------ param init ----------------------------------
def init_gate_weight(key, n_experts, gating_dim):
    # kaiming_uniform_(a=sqrt(5)) on (E, H) -> U(-1/sqrt(fan_in), 1/sqrt(fan_in))
    bound = 1.0 / math.sqrt(gating_dim)
    return jax.random.uniform(key, (n_experts, gating_dim),
                              dtype=jnp.float32, minval=-bound, maxval=bound)


# ----------------------------------- main ------------------------------------
if __name__ == "__main__":
    key = jax.random.PRNGKey(0)
    k_x, k_w = jax.random.split(key)

    hidden_states = jax.random.normal(k_x, (BSZ, SEQ, HIDDEN_SIZE), dtype=jnp.float32)
    weight = init_gate_weight(k_w, N_EXPERTS, HIDDEN_SIZE)

    topk_idx, topk_weight, aux_loss = moe_gate(hidden_states, weight)
    jax.block_until_ready((topk_idx, topk_weight))

    # lightweight reference check in plain JAX
    x2d = hidden_states.reshape(-1, HIDDEN_SIZE)
    scores_ref = jax.nn.softmax(x2d @ weight.T, axis=-1)
    ref_w, ref_i = jax.lax.top_k(scores_ref, TOP_K)
    if TOP_K > 1 and NORM_TOPK:
        ref_w = ref_w / (jnp.sum(ref_w, axis=-1, keepdims=True) + 1e-20)
    np.testing.assert_array_equal(np.asarray(topk_idx), np.asarray(ref_i))
    np.testing.assert_allclose(np.asarray(topk_weight), np.asarray(ref_w),
                               rtol=1e-5, atol=1e-6)

    print("KERNEL_OK")
</pallas_src>

<mosaic_0001>
module attributes {stable_mosaic.version = 11 : i64} {
  func.func @moe_gate_kernel(%arg0: i32, %arg1: memref<128x32xf32, #tpu.memory_space<vmem>>, %arg2: memref<8x32xf32, #tpu.memory_space<vmem>>, %arg3: memref<2x128xi32, #tpu.memory_space<vmem>>, %arg4: memref<2x128xf32, #tpu.memory_space<vmem>>) attributes {dimension_semantics = [#tpu.dimension_semantics<parallel>], iteration_bounds = array<i64: 1>, scalar_prefetch = 0 : i64, scratch_operands = 0 : i64, tpu.core_type = #tpu.core_type<tc>, window_params = [{transform_indices = @transform_0, window_bounds = array<i64: 128, 32>}, {pipeline_mode = #tpu.pipeline_mode<synchronous>, transform_indices = @transform_1, window_bounds = array<i64: 8, 32>}, {transform_indices = @transform_2, window_bounds = array<i64: 2, 128>}, {transform_indices = @transform_3, window_bounds = array<i64: 2, 128>}]} {
    %c0 = arith.constant 0 : index
    %c0_0 = arith.constant 0 : index
    %0 = vector.load %arg2[%c0, %c0_0] : memref<8x32xf32, #tpu.memory_space<vmem>>, vector<8x32xf32>
    %c0_1 = arith.constant 0 : index
    %c0_2 = arith.constant 0 : index
    %1 = vector.load %arg1[%c0_1, %c0_2] : memref<128x32xf32, #tpu.memory_space<vmem>>, vector<128x32xf32>
    %cst = arith.constant dense<0.000000e+00> : vector<8x128xf32>
    %2 = tpu.matmul %0, %1, %cst {dimension_numbers = #tpu.dot_dimension_numbers<[1], [1], [0], [0], [0, 0, 1, 0], [], []>} : vector<8x32xf32>, vector<128x32xf32>, vector<8x128xf32> -> vector<8x128xf32>
    %3 = tpu.iota {dimensions = array<i32: 0>} : vector<8x128xi32>
    %cst_3 = arith.constant dense<0xFF800000> : vector<128xf32>
    %4 = vector.multi_reduction <maximumf>, %2, %cst_3 [0] : vector<8x128xf32> to vector<128xf32>
    %5 = vector.shape_cast %4 : vector<128xf32> to vector<1x128xf32>
    %cst_4 = arith.constant dense<0xFF800000> : vector<128xf32>
    %6 = vector.multi_reduction <maximumf>, %2, %cst_4 [0] : vector<8x128xf32> to vector<128xf32>
    %7 = vector.shape_cast %6 : vector<128xf32> to vector<1x128xf32>
    %8 = vector.broadcast %7 : vector<1x128xf32> to vector<8x128xf32>
    %9 = arith.cmpf oeq, %2, %8 : vector<8x128xf32>
    %c8_i32 = arith.constant 8 : i32
    %10 = vector.broadcast %c8_i32 : i32 to vector<8x128xi32>
    %11 = arith.select %9, %3, %10 : vector<8x128xi1>, vector<8x128xi32>
    %cst_5 = arith.constant dense<2147483647> : vector<128xi32>
    %12 = vector.multi_reduction <minsi>, %11, %cst_5 [0] : vector<8x128xi32> to vector<128xi32>
    %13 = vector.shape_cast %12 : vector<128xi32> to vector<1x128xi32>
    %14 = vector.broadcast %13 : vector<1x128xi32> to vector<8x128xi32>
    %15 = arith.cmpi eq, %3, %14 : vector<8x128xi32>
    %cst_6 = arith.constant 0xFF800000 : f32
    %16 = vector.broadcast %cst_6 : f32 to vector<8x128xf32>
    %17 = arith.select %15, %16, %2 : vector<8x128xi1>, vector<8x128xf32>
    %cst_7 = arith.constant dense<0xFF800000> : vector<128xf32>
    %18 = vector.multi_reduction <maximumf>, %17, %cst_7 [0] : vector<8x128xf32> to vector<128xf32>
    %19 = vector.shape_cast %18 : vector<128xf32> to vector<1x128xf32>
    %20 = vector.broadcast %19 : vector<1x128xf32> to vector<8x128xf32>
    %21 = arith.cmpf oeq, %17, %20 : vector<8x128xf32>
    %c8_i32_8 = arith.constant 8 : i32
    %22 = vector.broadcast %c8_i32_8 : i32 to vector<8x128xi32>
    %23 = arith.select %21, %3, %22 : vector<8x128xi1>, vector<8x128xi32>
    %cst_9 = arith.constant dense<2147483647> : vector<128xi32>
    %24 = vector.multi_reduction <minsi>, %23, %cst_9 [0] : vector<8x128xi32> to vector<128xi32>
    %25 = vector.shape_cast %24 : vector<128xi32> to vector<1x128xi32>
    %26 = tpu.concatenate %7, %19 in 0 : vector<1x128xf32>, vector<1x128xf32> -> vector<2x128xf32>
    %27 = tpu.concatenate %13, %25 in 0 : vector<1x128xi32>, vector<1x128xi32> -> vector<2x128xi32>
    %28 = vector.broadcast %5 : vector<1x128xf32> to vector<2x128xf32>
    %29 = arith.subf %26, %28 : vector<2x128xf32>
    %30 = math.exp %29 : vector<2x128xf32>
    %cst_10 = arith.constant dense<0.000000e+00> : vector<128xf32>
    %31 = vector.multi_reduction <add>, %30, %cst_10 [0] : vector<2x128xf32> to vector<128xf32>
    %32 = vector.shape_cast %31 : vector<128xf32> to vector<1x128xf32>
    %cst_11 = arith.constant 9.99999968E-21 : f32
    %33 = vector.broadcast %cst_11 : f32 to vector<1x128xf32>
    %34 = arith.addf %32, %33 : vector<1x128xf32>
    %35 = vector.broadcast %34 : vector<1x128xf32> to vector<2x128xf32>
    %36 = arith.divf %30, %35 : vector<2x128xf32>
    %c0_12 = arith.constant 0 : index
    %c0_13 = arith.constant 0 : index
    %37 = vector.load %arg3[%c0_12, %c0_13] : memref<2x128xi32, #tpu.memory_space<vmem>>, vector<2x128xi32>
    tpu.vector_store %arg3[%c0_12, %c0_13], %27 {strides = array<i32>} : memref<2x128xi32, #tpu.memory_space<vmem>>, vector<2x128xi32>,
    %c0_14 = arith.constant 0 : index
    %c0_15 = arith.constant 0 : index
    %38 = vector.load %arg4[%c0_14, %c0_15] : memref<2x128xf32, #tpu.memory_space<vmem>>, vector<2x128xf32>
    tpu.vector_store %arg4[%c0_14, %c0_15], %36 {strides = array<i32>} : memref<2x128xf32, #tpu.memory_space<vmem>>, vector<2x128xf32>,
    return
  }
  func.func @transform_0(%arg0: i32) -> (i32, i32) {
    %c0_i32 = arith.constant 0 : i32
    %c0_i32_0 = arith.constant 0 : i32
    return %arg0, %c0_i32 : i32, i32
  }
  func.func @transform_1(%arg0: i32) -> (i32, i32) {
    %c0_i32 = arith.constant 0 : i32
    %c0_i32_0 = arith.constant 0 : i32
    %c0_i32_1 = arith.constant 0 : i32
    return %c0_i32, %c0_i32_0 : i32, i32
  }
  func.func @transform_2(%arg0: i32) -> (i32, i32) {
    %c0_i32 = arith.constant 0 : i32
    %c0_i32_0 = arith.constant 0 : i32
    return %c0_i32, %arg0 : i32, i32
  }
  func.func @transform_3(%arg0: i32) -> (i32, i32) {
    %c0_i32 = arith.constant 0 : i32
    %c0_i32_0 = arith.constant 0 : i32
    return %c0_i32, %arg0 : i32, i32
  }
}

</mosaic_0001>

<bundles_post_ra>
// kernel: tpu_custom_call.1
= control target key start
LH: loop header
LB: loop body
LE: loop exit
PB: predicated region body
PF: predicated region fallthrough
CT: control target
= control target key end

     0   :  { %9 = vsyncpa [#allocation3], 0  ;;  %vm32_vm0 = vcmask 261120   ;;  %v397_v2 = vmov 0.0|0.0   ;;  %vm398_vm2 = vmmov 0   ;;  %v399_v5 = vmov 0.0   ;;  %s522_s0 = inlined_call_operand.vmem [shape: f32[128,32], index: 0, kind: input, shape index: {}]   ;;  %s523_s1 = inlined_call_operand.vmem [shape: f32[8,32], index: 1, kind: input, shape index: {}]   ;;  %s524_s2 = inlined_call_operand.hbm [shape: s32[2,128], index: 2, kind: output, shape index: {0}]   ;;  %s525_s3 = inlined_call_operand.hbm [shape: f32[2,128], index: 3, kind: output, shape index: {1}]  }
   0x1   :  { %v16_v0 = vld [vmem:[%s522_s0] sm:$0xff]  ;;  %v17_v1 = vld [vmem:[%s522_s0 + $0x8] sm:$0xff]  ;;  %308 = vmatprep.subr.bf16.mxu0 %v397_v2  ;;  %vm430_vm1 = vmpackc.low %vm32_vm0, %vm32_vm0  ;;  %305 = vmatprep.mubr.msk.f32.mxu0 %vm398_vm2, %v399_v5 }
   0x2   :  { %v309_v3 = vpack.c.bf16 %v17_v1, %v16_v0  ;;  %v18_v6 = vld [vmem:[%s522_s0 + $0x10] sm:$0xff]  ;;  %v19_v7 = vld [vmem:[%s522_s0 + $0x18] sm:$0xff] }
   0x4   :  { %311 = vmatpush3.bf16.xpose.msk.msra.mxu0 %vm430_vm1, %v309_v3 }
   0x5   :  { %312 = vmatprep.subr.bf16.mxu0 %v397_v2 }
   0x6   :  { %10 = vsyncpa [#allocation5], 0  ;;  %v313_v8 = vpack.c.bf16 %v19_v7, %v18_v6  ;;  %v20_v9 = vld [vmem:[%s522_s0 + $0x20] sm:$0xff]  ;;  %v21_v10 = vld [vmem:[%s522_s0 + $0x28] sm:$0xff]  ;;  %v154_v33 = vlaneseq  ;;  %vm192_vm8 = vcmask 1040384   ;;  %vm198_vm13 = vcmask 1041408  }
   0x7   :  { %v317_v11 = vpack.c.bf16 %v21_v10, %v20_v9  ;;  %v22_v12 = vld [vmem:[%s522_s0 + $0x30] sm:$0xff]  ;;  %v23_v13 = vld [vmem:[%s522_s0 + $0x38] sm:$0xff]  ;;  %v24_v15 = vld [vmem:[%s522_s0 + $0x40] sm:$0xff] }
   0x8   :  { %v321_v14 = vpack.c.bf16 %v23_v13, %v22_v12  ;;  %v25_v16 = vld [vmem:[%s522_s0 + $0x48] sm:$0xff]  ;;  %v26_v18 = vld [vmem:[%s522_s0 + $0x50] sm:$0xff]  ;;  %v27_v19 = vld [vmem:[%s522_s0 + $0x58] sm:$0xff]  ;;  %v155_v36 = vshrl.u32 %v154_v33, 7 }
   0x9   :  { %v325_v17 = vpack.c.bf16 %v25_v16, %v24_v15  ;;  %v329_v20 = vpack.c.bf16 %v27_v19, %v26_v18  ;;  %v28_v21 = vld [vmem:[%s522_s0 + $0x60] sm:$0xff]  ;;  %v29_v22 = vld [vmem:[%s522_s0 + $0x68] sm:$0xff]  ;;  %v30_v24 = vld [vmem:[%s522_s0 + $0x70] sm:$0xff] }
   0xa   :  { %v333_v23 = vpack.c.bf16 %v29_v22, %v28_v21  ;;  %v31_v25 = vld [vmem:[%s522_s0 + $0x78] sm:$0xff]  ;;  %v15_v27 = vld [vmem:[%s523_s1] sm:$0xff]  ;;  %s400_s0 = smov [#allocation2]  }
   0xb   :  { %v337_v26 = vpack.c.bf16 %v31_v25, %v30_v24  ;;  %s217_s1 = sshll.u32 %s400_s0, 4  ;;  %s218_s1 = int_to_ptr.vmem [resolvable:$true] %s217_s1 }
   0xc   :  { %315 = vmatpush3.bf16.xpose.msk.msra.mxu0 %vm430_vm1, %v313_v8  ;;  %s349_s19 = scalar_lea.vmem %s218_s1, 32  ;;  %p354_p1 = scmp.lt.s32.totalorder %s218_s1, %s218_s1 }
   0xd   :  { %316 = vmatprep.subr.bf16.mxu0 %v397_v2  ;;  %p350_p0 = scmp.ne.s32.totalorder %s218_s1, %s349_s19  ;;  %p355_p2 = scmp.lt.s32.totalorder %s349_s19, %s349_s19 }
   0xf   :  { %p356_p3 = por %p355_p2, %p354_p1 }
  0x11   :  { %p357_p4 = pnand %p356_p3, %p350_p0 }
  0x14   :  { %319 = vmatpush3.bf16.xpose.msk.msra.mxu0 %vm430_vm1, %v317_v11 }
  0x15   :  { %320 = vmatprep.subr.bf16.mxu0 %v397_v2 }
  0x1c   :  { %323 = vmatpush3.bf16.xpose.msk.msra.mxu0 %vm430_vm1, %v321_v14 }
  0x1d   :  { %324 = vmatprep.subr.bf16.mxu0 %v397_v2 }
  0x24   :  { %327 = vmatpush3.bf16.xpose.msk.msra.mxu0 %vm430_vm1, %v325_v17 }
  0x25   :  { %328 = vmatprep.subr.bf16.mxu0 %v397_v2 }
  0x2c   :  { %331 = vmatpush3.bf16.xpose.msk.msra.mxu0 %vm430_vm1, %v329_v20 }
  0x2d   :  { %332 = vmatprep.subr.bf16.mxu0 %v397_v2 }
  0x34   :  { %335 = vmatpush3.bf16.xpose.msk.msra.mxu0 %vm430_vm1, %v333_v23 }
  0x35   :  { %336 = vmatprep.subr.bf16.mxu0 %v397_v2 }
  0x3c   :  { %339 = vmatpush3.bf16.xpose.msk.msra.mxu0 %vm430_vm1, %v337_v26 }
  0x43   :  { %306 = vmatmul.mubr.msk.f32.vlgmr.msra.gmra.mrb[0].mxu0 %vm32_vm0, %v15_v27 }
 0x116   :  { %v150_v28 = vpop.f32.mrb[0].mxu0 }
 0x117   :  { %v156_v29 = vrot.slane %v150_v28, 4  ;;  %v307_v30 = vpop.f32.mrb[1].mxu0 }
 0x119   :  { %v157_v31 = vmax.f32 %v150_v28, %v156_v29 }
 0x11b   :  { %v158_v32 = vrot.slane %v157_v31, 2 }
 0x11d   :  { %v159_v34 = vmax.f32 %v157_v31, %v158_v32 }
 0x11f   :  { %v160_v35 = vrot.slane %v159_v34, 1 }
 0x121   :  { %v161_v37 = vmax.f32 %v159_v34, %v160_v35 }
 0x123   :  { %vm162_vm3 = vcmp.eq.f32.partialorder %v150_v28, %v161_v37 }
 0x124   :  { %v163_v38 = vsel %vm162_vm3, %v155_v36, 8 }
 0x125   :  { %v164_v39 = vrot.slane %v163_v38, 4 }
 0x127   :  { %vm165_vm4 = vcmp.lt.s32.totalorder %v163_v38, %v164_v39 }
 0x128   :  { %v166_v40 = vsel %vm165_vm4, %v163_v38, %v164_v39 }
 0x129   :  { %v167_v41 = vrot.slane %v166_v40, 2 }
 0x12b   :  { %vm168_vm5 = vcmp.lt.s32.totalorder %v166_v40, %v167_v41 }
 0x12c   :  { %v169_v42 = vsel %vm168_vm5, %v166_v40, %v167_v41 }
 0x12d   :  { %v170_v43 = vrot.slane %v169_v42, 1 }
 0x12f   :  { %vm171_vm6 = vcmp.lt.s32.totalorder %v169_v42, %v170_v43 }
 0x130   :  { %v172_v44 = vsel %vm171_vm6, %v169_v42, %v170_v43 }
 0x131   :  { %vm173_vm7 = vcmp.eq.s32.totalorder %v155_v36, %v172_v44 }
 0x132   :  { %v174_v45 = vsel %vm173_vm7, -inf, %v150_v28 }
 0x133   :  { %v175_v46 = vrot.slane %v174_v45, 4 }
 0x135   :  { %v176_v47 = vmax.f32 %v174_v45, %v175_v46 }
 0x137   :  { %v177_v48 = vrot.slane %v176_v47, 2 }
 0x139   :  { %v178_v49 = vmax.f32 %v176_v47, %v177_v48 }
 0x13b   :  { %v179_v50 = vrot.slane %v178_v49, 1 }
 0x13d   :  { %v180_v51 = vmax.f32 %v178_v49, %v179_v50 }
 0x13f   :  { %vm181_vm9 = vcmp.eq.f32.partialorder %v174_v45, %v180_v51  ;;  %v193_v52 = vsel %vm192_vm8, %v161_v37, %v180_v51 }
 0x140   :  { %v182_v53 = vsel %vm181_vm9, %v155_v36, 8  ;;  %v195_v54 = vsub.f32 %v193_v52, %v161_v37 }
 0x141   :  { %v183_v55 = vrot.slane %v182_v53, 4 }
 0x142   :  { %v196_v56 = vmul.f32 1.442695, %v195_v54 }
 0x143   :  { %vm184_vm10 = vcmp.lt.s32.totalorder %v182_v53, %v183_v55 }
 0x144   :  { %v185_v57 = vsel %vm184_vm10, %v182_v53, %v183_v55  ;;  %345 = vpow2.f32 %v196_v56 }
 0x145   :  { %v186_v58 = vrot.slane %v185_v57, 2 }
 0x147   :  { %vm187_vm11 = vcmp.lt.s32.totalorder %v185_v57, %v186_v58 }
 0x148   :  { %v188_v59 = vsel %vm187_vm11, %v185_v57, %v186_v58 }
 0x149   :  { %v189_v60 = vrot.slane %v188_v59, 1 }
 0x14b   :  { %vm190_vm12 = vcmp.lt.s32.totalorder %v188_v59, %v189_v60 }
 0x14c   :  { %v191_v61 = vsel %vm190_vm12, %v188_v59, %v189_v60 }
 0x14d   :  { %v194_v62 = vsel %vm192_vm8, %v172_v44, %v191_v61 }
 0x14e   :  { %v346_v63 = vpop.eup %345  ;;  %209 = vst [vmem:[#allocation2] sm:$0x3] %v194_v62 }
 0x14f   :  { %v199_v0 = vsel %vm198_vm13, %v346_v63, 0.0 }
 0x150   :  { %360 = shalt.err (!%p357_p4)
}
 0x151   :  { %s361_s22 = scalar_lea.hbm %s524_s2, 32 }
 0x152   :  { %p362_p5 = scmp.ne.s32.totalorder %s524_s2, %s361_s22  ;;  %p365_p6 = scmp.lt.u32.totalorder %s361_s22, %s524_s2 }
 0x154   :  { %p367_p7 = pnand %p365_p6, %p362_p5 }
 0x156   :  { %370 = shalt.err (!%p367_p7)
}
 0x157   :  { %220 = dma.vmem_to_hbm [thread:$0]  %s218_s1, 32, %s524_s2, [#allocation3]   ;;  %v200_v1 = vrot.slane %v199_v0, 4 }
 0x158   :  { %s401_s29 = smov [#allocation4]  }
 0x159   :  { %v201_v2 = vadd.f32 %v200_v1, %v199_v0  ;;  %s227_s30 = sshll.u32 %s401_s29, 4  ;;  %s228_s30 = int_to_ptr.vmem [resolvable:$true] %s227_s30 }
 0x15a   :  { %s371_s4 = scalar_lea.vmem %s228_s30, 32  ;;  %p376_p9 = scmp.lt.s32.totalorder %s228_s30, %s228_s30 }
 0x15b   :  { %v202_v3 = vrot.slane %v201_v2, 2  ;;  %p372_p8 = scmp.ne.s32.totalorder %s228_s30, %s371_s4  ;;  %p377_p10 = scmp.lt.s32.totalorder %s371_s4, %s371_s4 }
 0x15d   :  { %v203_v4 = vadd.f32 %v202_v3, %v201_v2  ;;  %p378_p11 = por %p377_p10, %p376_p9 }
 0x15f   :  { %v204_v5 = vrot.slane %v203_v4, 1  ;;  %p379_p12 = pnand %p378_p11, %p372_p8 }
 0x161   :  { %v205_v6 = vadd.f32 %v204_v5, %v203_v4 }
 0x163   :  { %v206_v7 = vadd.f32 1e-20, %v205_v6 }
 0x165   :  { %347 = vrcp.f32 %v206_v7 }
 0x16f   :  { %v348_v8 = vpop.eup %347 }
 0x170   :  { %v208_v9 = vmul.f32 %v348_v8, %v346_v63 }
 0x172   :  { %210 = vst [vmem:[#allocation4] sm:$0x3] %v208_v9 }
 0x173   :  { %382 = shalt.err (!%p379_p12)
}
 0x174   :  { %s383_s6 = scalar_lea.hbm %s525_s3, 32 }
 0x175   :  { %p384_p13 = scmp.ne.s32.totalorder %s525_s3, %s383_s6  ;;  %p387_p0 = scmp.lt.u32.totalorder %s383_s6, %s525_s3 }
 0x177   :  { %p389_p1 = pnand %p387_p0, %p384_p13 }
 0x179   :  { %392 = shalt.err (!%p389_p1)
}
 0x17a   :  { %230 = dma.vmem_to_hbm [thread:$0]  %s228_s30, 32, %s525_s3, [#allocation5]  }
 0x17b   :  { %393 = dma.done.wait [#allocation3], 32  }
 0x17c   :  { %394 = vsyncadd [#allocation3], 4294967264 }
 0x17d   :  { %395 = dma.done.wait [#allocation5], 32  }
 0x17e   :  { %396 = vsyncadd [#allocation5], 4294967264 }
 0x17f   :  { %237 = vsyncpa [#allocation3], 1 }
 0x180   :  { %238 = vsyncpa [#allocation5], 1 }

</bundles_post_ra>
